<compile_context>
chip_gen: v7x
topology: tpu7x:2x2x1
jax: 0.10.0
libtpu: 0.0.40
codegen_flags: <defaults>
</compile_context>

<pallas_src>
import jax
import jax.numpy as jnp
from jax.experimental import pallas as pl
from jax.experimental.pallas import tpu as pltpu


def _pblaf_kernel(x_ref, pos_ref, bias_ref, o_ref):
    # x_ref: (TB, E), pos_ref: (TB, 1) int32, bias_ref: (P, E), o_ref: (TB, E)
    TB = x_ref.shape[0]
    P = bias_ref.shape[0]

    pos = pos_ref[...]                                            # (TB, 1) int32
    # In-kernel gather via one-hot matmul on the MXU: (TB, P) @ (P, E).
    p_iota = jax.lax.broadcasted_iota(jnp.int32, (TB, P), 1)      # (TB, P)
    one_hot = (pos == p_iota).astype(jnp.float32)                 # (TB, P)
    bias_rows = jnp.dot(one_hot, bias_ref[...].astype(jnp.float32),
                        preferred_element_type=jnp.float32)       # (TB, E) f32

    o_ref[...] = (x_ref[...].astype(jnp.float32) + bias_rows).astype(o_ref.dtype)


def _round_up(a: int, m: int) -> int:
    return (a + m - 1) // m * m


def position_bias_aware_learning_framework(
    x: jax.Array,             # (B, E) float
    pos: jax.Array,           # (B,)   int
    position_bias: jax.Array, # (P, E) float embedding table
    *,
    max_tile_rows: int = 512,
) -> jax.Array:
    B, E = x.shape
    P, E2 = position_bias.shape
    assert E == E2, "embedding width mismatch"

    # pos must be int32 on TPU (PyTorch long / int64 is cast here).
    pos2d = pos.astype(jnp.int32).reshape(B, 1)

    # Row tile: multiple of 8 sublanes, capped by max_tile_rows; pad B so the
    # tile divides evenly (padded rows use bias row 0 and are sliced off).
    TB = min(max_tile_rows, _round_up(B, 8))
    Bp = _round_up(B, TB)
    if Bp != B:
        x = jnp.pad(x, ((0, Bp - B), (0, 0)))
        pos2d = jnp.pad(pos2d, ((0, Bp - B), (0, 0)))

    grid = (Bp // TB,)

    out = pl.pallas_call(
        _pblaf_kernel,
        grid=grid,
        in_specs=[
            pl.BlockSpec((TB, E), lambda i: (i, 0)),   # x row tile
            pl.BlockSpec((TB, 1), lambda i: (i, 0)),   # positions for this tile
            pl.BlockSpec((P, E), lambda i: (0, 0)),    # full table, VMEM-resident
        ],
        out_specs=pl.BlockSpec((TB, E), lambda i: (i, 0)),
        out_shape=jax.ShapeDtypeStruct((Bp, E), x.dtype),
        compiler_params=pltpu.CompilerParams(
            dimension_semantics=("parallel",),          # independent row tiles
        ),
    )(x, pos2d, position_bias)

    return out[:B] if Bp != B else out


if __name__ == "__main__":
    # Small shapes consistent with the module's forward:
    #   batch B = 8, embedding/input size E = 128, max_num_position P = 16
    B, E, P = 8, 128, 16

    key = jax.random.PRNGKey(0)
    k_x, k_pos, k_emb = jax.random.split(key, 3)

    x = jax.random.normal(k_x, (B, E), dtype=jnp.float32)
    pos = jax.random.randint(k_pos, (B,), 0, P, dtype=jnp.int32)
    # nn.Embedding default init: N(0, 1)
    position_bias = jax.random.normal(k_emb, (P, E), dtype=jnp.float32)

    out = position_bias_aware_learning_framework(x, pos, position_bias)
    out = jax.block_until_ready(out)

    # Reference check (plain JAX)
    ref = x + position_bias[pos]
    assert out.shape == (B, E)
    assert out.dtype == jnp.float32
    assert jnp.allclose(out, ref, atol=1e-5, rtol=1e-5)

    print("KERNEL_OK")
</pallas_src>

<mosaic_0001>
module attributes {stable_mosaic.version = 11 : i64} {
  func.func @_pblaf_kernel(%arg0: i32, %arg1: memref<8x128xf32, #tpu.memory_space<vmem>>, %arg2: memref<8x1xi32, #tpu.memory_space<vmem>>, %arg3: memref<16x128xf32, #tpu.memory_space<vmem>>, %arg4: memref<8x128xf32, #tpu.memory_space<vmem>>) attributes {dimension_semantics = [#tpu.dimension_semantics<parallel>], iteration_bounds = array<i64: 1>, scalar_prefetch = 0 : i64, scratch_operands = 0 : i64, tpu.core_type = #tpu.core_type<tc>, window_params = [{transform_indices = @transform_0, window_bounds = array<i64: 8, 128>}, {transform_indices = @transform_1, window_bounds = array<i64: 8, 1>}, {pipeline_mode = #tpu.pipeline_mode<synchronous>, transform_indices = @transform_2, window_bounds = array<i64: 16, 128>}, {transform_indices = @transform_3, window_bounds = array<i64: 8, 128>}]} {
    %c0 = arith.constant 0 : index
    %c0_0 = arith.constant 0 : index
    %0 = vector.load %arg2[%c0, %c0_0] : memref<8x1xi32, #tpu.memory_space<vmem>>, vector<8x1xi32>
    %1 = tpu.iota {dimensions = array<i32: 1>} : vector<8x16xi32>
    %2 = vector.broadcast %0 : vector<8x1xi32> to vector<8x16xi32>
    %3 = arith.cmpi eq, %2, %1 : vector<8x16xi32>
    %4 = arith.extui %3 : vector<8x16xi1> to vector<8x16xi32>
    %5 = arith.sitofp %4 : vector<8x16xi32> to vector<8x16xf32>
    %c0_1 = arith.constant 0 : index
    %c0_2 = arith.constant 0 : index
    %6 = vector.load %arg3[%c0_1, %c0_2] : memref<16x128xf32, #tpu.memory_space<vmem>>, vector<16x128xf32>
    %cst = arith.constant dense<0.000000e+00> : vector<8x128xf32>
    %7 = tpu.matmul %5, %6, %cst {dimension_numbers = #tpu.dot_dimension_numbers<[1], [0], [0], [1], [0, 0, 1, 1], [], []>} : vector<8x16xf32>, vector<16x128xf32>, vector<8x128xf32> -> vector<8x128xf32>
    %c0_3 = arith.constant 0 : index
    %c0_4 = arith.constant 0 : index
    %8 = vector.load %arg1[%c0_3, %c0_4] : memref<8x128xf32, #tpu.memory_space<vmem>>, vector<8x128xf32>
    %9 = arith.addf %8, %7 : vector<8x128xf32>
    %c0_5 = arith.constant 0 : index
    %c0_6 = arith.constant 0 : index
    %10 = vector.load %arg4[%c0_5, %c0_6] : memref<8x128xf32, #tpu.memory_space<vmem>>, vector<8x128xf32>
    tpu.vector_store %arg4[%c0_5, %c0_6], %9 {strides = array<i32>} : memref<8x128xf32, #tpu.memory_space<vmem>>, vector<8x128xf32>,
    return
  }
  func.func @transform_0(%arg0: i32) -> (i32, i32) {
    %c0_i32 = arith.constant 0 : i32
    %c0_i32_0 = arith.constant 0 : i32
    return %arg0, %c0_i32 : i32, i32
  }
  func.func @transform_1(%arg0: i32) -> (i32, i32) {
    %c0_i32 = arith.constant 0 : i32
    %c0_i32_0 = arith.constant 0 : i32
    return %arg0, %c0_i32 : i32, i32
  }
  func.func @transform_2(%arg0: i32) -> (i32, i32) {
    %c0_i32 = arith.constant 0 : i32
    %c0_i32_0 = arith.constant 0 : i32
    %c0_i32_1 = arith.constant 0 : i32
    return %c0_i32, %c0_i32_0 : i32, i32
  }
  func.func @transform_3(%arg0: i32) -> (i32, i32) {
    %c0_i32 = arith.constant 0 : i32
    %c0_i32_0 = arith.constant 0 : i32
    return %arg0, %c0_i32 : i32, i32
  }
}

</mosaic_0001>

<bundles_post_ra>
// kernel: tpu_custom_call.1
= control target key start
LH: loop header
LB: loop body
LE: loop exit
PB: predicated region body
PF: predicated region fallthrough
CT: control target
= control target key end

     0   :  { %8 = vsyncpa [#allocation3], 0  ;;  %s259_s0 = inlined_call_operand.hbm [shape: f32[8,128], index: 0, kind: input, shape index: {}]   ;;  %s260_s1 = inlined_call_operand.vmem [shape: s32[8,1], index: 1, kind: input, shape index: {}]   ;;  %s261_s2 = inlined_call_operand.vmem [shape: f32[16,128], index: 2, kind: input, shape index: {}]   ;;  %s262_s3 = inlined_call_operand.hbm [shape: f32[8,128], index: 3, kind: output, shape index: {}]  }
   0x1   :  { %9 = vsyncpa [#allocation4], 0  ;;  %s200_s12 = smov [#allocation2]   ;;  %s152_s16 = scalar_lea.hbm %s259_s0, 128 }
   0x2   :  { %s16_s13 = sshll.u32 %s200_s12, 4  ;;  %p153_p0 = scmp.ne.s32.totalorder %s259_s0, %s152_s16  ;;  %s17_s13 = int_to_ptr.vmem [resolvable:$true] %s16_s13 }
   0x3   :  { %p156_p1 = scmp.lt.u32.totalorder %s152_s16, %s259_s0 }
   0x5   :  { %p158_p2 = pnand %p156_p1, %p153_p0 }
   0x7   :  { %161 = shalt.err (!%p158_p2)
}
   0x8   :  { %s162_s21 = scalar_lea.vmem %s17_s13, 128  ;;  %p167_p4 = scmp.lt.s32.totalorder %s17_s13, %s17_s13 }
   0x9   :  { %p163_p3 = scmp.ne.s32.totalorder %s17_s13, %s162_s21  ;;  %p168_p5 = scmp.lt.s32.totalorder %s162_s21, %s162_s21 }
   0xb   :  { %p169_p6 = por %p168_p5, %p167_p4 }
   0xd   :  { %p170_p7 = pnand %p169_p6, %p163_p3 }
   0xf   :  { %173 = shalt.err (!%p170_p7)
}
  0x10   :  { %19 = dma.hbm_to_vmem [thread:$0]  %s259_s0, 128, %s17_s13, [#allocation3]  }
  0x11   :  { %196 = dma.done.wait [#allocation3], 128  }
  0x12   :  { %197 = vsyncadd [#allocation3], 4294967168  ;;  %v201_v0 = vmov 0   ;;  %v202_v1 = vmov 0.0|0.0   ;;  %v27_v2 = vld [vmem:[%s260_s1] sm:$0xff]  ;;  %v37_v4 = vld [vmem:[%s261_s2 + $0x8] sm:$0xff]  ;;  %v28_v7 = vlaneseq }
  0x13   :  { %151 = vset.pattern.permute.xlu0 %v201_v0  ;;  %142 = vmatprep.subr.bf16.mxu0 %v202_v1  ;;  %v36_v3 = vld [vmem:[%s261_s2] sm:$0xff]  ;;  %vm203_vm0 = vmmov 0   ;;  %v204_v6 = vmov 0.0   ;;  %vm38_vm1 = vcmask 130048   ;;  %s205_s0 = smov [#allocation5]  }
  0x14   :  { %31 = vperm.xlu0 %151, %v27_v2   ;;  %v143_v5 = vpack.c.bf16 %v37_v4, %v36_v3  ;;  %139 = vmatprep.mubr.msk.f32.mxu0 %vm203_vm0, %v204_v6  ;;  %v29_v8 = vand.u32 127, %v28_v7  ;;  %v112_v11 = vld [vmem:[#allocation2] sm:$0xff]  ;;  %s121_s1 = sshll.u32 %s205_s0, 4  ;;  %s122_s1 = int_to_ptr.vmem [resolvable:$true] %s121_s1 }
  0x15   :  { %s174_s2 = scalar_lea.vmem %s122_s1, 128  ;;  %p179_p9 = scmp.lt.s32.totalorder %s122_s1, %s122_s1 }
  0x16   :  { %144 = vmatpush3.bf16.msra.mxu0 %v143_v5  ;;  %p175_p8 = scmp.ne.s32.totalorder %s122_s1, %s174_s2  ;;  %p180_p10 = scmp.lt.s32.totalorder %s174_s2, %s174_s2 }
  0x18   :  { %p181_p11 = por %p180_p10, %p179_p9 }
  0x1a   :  { %p182_p12 = pnand %p181_p11, %p175_p8 }
  0x93   :  { %v32_v9 = vpop.permute.xlu0 %31 }
  0x94   :  { %vm33_vm2 = vcmp.eq.s32.totalorder %v32_v9, %v29_v8 }
  0x95   :  { %v130_v10 = vsel %vm33_vm2, 1.0, %v204_v6 }
  0x96   :  { %140 = vmatmul.mubr.msk.f32.vlgmr.msra.gmra.mrb[0].mxu0 %vm38_vm1, %v130_v10 }
 0x169   :  { %v108_v12 = vpop.f32.mrb[0].mxu0 }
 0x16a   :  { %v113_v13 = vadd.f32 %v112_v11, %v108_v12  ;;  %v141_v14 = vpop.f32.mrb[1].mxu0 }
 0x16c   :  { %114 = vst [vmem:[#allocation5] sm:$0xff] %v113_v13 }
 0x16d   :  { %185 = shalt.err (!%p182_p12)
}
 0x16e   :  { %s186_s5 = scalar_lea.hbm %s262_s3, 128 }
 0x16f   :  { %p187_p13 = scmp.ne.s32.totalorder %s262_s3, %s186_s5  ;;  %p190_p0 = scmp.lt.u32.totalorder %s186_s5, %s262_s3 }
 0x171   :  { %p192_p1 = pnand %p190_p0, %p187_p13 }
 0x173   :  { %195 = shalt.err (!%p192_p1)
}
 0x174   :  { %124 = dma.vmem_to_hbm [thread:$0]  %s122_s1, 128, %s262_s3, [#allocation4]  }
 0x175   :  { %198 = dma.done.wait [#allocation4], 128  }
 0x176   :  { %199 = vsyncadd [#allocation4], 4294967168 }
 0x177   :  { %128 = vsyncpa [#allocation3], 1 }
 0x178   :  { %129 = vsyncpa [#allocation4], 1 }

</bundles_post_ra>
